<compile_context>
chip_gen: v5e
topology: v5e:2x2
jax: 0.10.0
libtpu: 0.0.40
codegen_flags: <defaults>
</compile_context>

<pallas_src>
import jax
import jax.numpy as jnp
from jax.experimental import pallas as pl
from jax.experimental.pallas import tpu as pltpu

_LANES = 128          # TPU lane width: keep the last dim lane-dense (unmasked vld).
_MAX_TILE_ROWS = 512  # 512x128 f32 = 256 KiB per input per pipeline buffer.


def _round_up(x, m):
    return (x + m - 1) // m * m


def _sum_sq_diff_kernel(a_ref, b_ref, out_ref, acc_ref):
    """Accumulates sum((a - b)^2) over a 1-D grid of (tile_rows, 128) blocks."""
    @pl.when(pl.program_id(0) == 0)
    def _init():
        acc_ref[...] = jnp.zeros_like(acc_ref)

    d = a_ref[...].astype(jnp.float32) - b_ref[...].astype(jnp.float32)
    # Per-lane partial sums (sublane reduce only): keeps per-step work on the
    # VPU/XLU and avoids a scalar SMEM read-modify-write every grid step.
    acc_ref[...] += jnp.sum(d * d, axis=0, keepdims=True)

    @pl.when(pl.program_id(0) == pl.num_programs(0) - 1)
    def _finalize():
        out_ref[0, 0] = jnp.sum(acc_ref[...])


def _sum_sq_diff(a, b):
    """sum((a - b)^2) over all elements, accumulated in float32."""
    assert a.shape == b.shape
    n = a.size
    a1 = a.reshape(-1)
    b1 = b.reshape(-1)

    rows = pl.cdiv(n, _LANES)
    tile_rows = _MAX_TILE_ROWS if rows >= _MAX_TILE_ROWS else _round_up(max(rows, 1), 8)
    padded_rows = _round_up(rows, tile_rows)
    padded_n = padded_rows * _LANES
    pad = padded_n - n
    if pad:
        # Zero padding is exact: padded positions contribute (0 - 0)^2 = 0 and the
        # mean divisor stays the true element count. Inputs keep their original
        # dtype (no wrapper-side f32 upcast -> no extra HBM traffic).
        a1 = jnp.pad(a1, (0, pad))
        b1 = jnp.pad(b1, (0, pad))
    a2 = a1.reshape(padded_rows, _LANES)
    b2 = b1.reshape(padded_rows, _LANES)

    grid = (padded_rows // tile_rows,)
    bytes_accessed = padded_n * (a2.dtype.itemsize + b2.dtype.itemsize) + 4

    ssq = pl.pallas_call(
        _sum_sq_diff_kernel,
        out_shape=jax.ShapeDtypeStruct((1, 1), jnp.float32),
        grid_spec=pltpu.PrefetchScalarGridSpec(
            num_scalar_prefetch=0,
            grid=grid,
            in_specs=[
                pl.BlockSpec((tile_rows, _LANES), lambda i: (i, 0)),
                pl.BlockSpec((tile_rows, _LANES), lambda i: (i, 0)),
            ],
            out_specs=pl.BlockSpec(memory_space=pltpu.MemorySpace.SMEM),
            scratch_shapes=[pltpu.VMEM((1, _LANES), jnp.float32)],
        ),
        compiler_params=pltpu.CompilerParams(
            dimension_semantics=("arbitrary",)),  # reduction axis
        cost_estimate=pl.CostEstimate(
            flops=3 * padded_n, transcendentals=0, bytes_accessed=bytes_accessed),
    )(a2, b2)
    return ssq[0, 0]


def joint_eloss_mse_ref(x_tilde, x, h_hat_supervise, h):
    """Pure-JAX reference (mirrors the PyTorch module, 'MSE' branch)."""
    x_tilde = x_tilde.astype(jnp.float32)
    x = x.astype(jnp.float32)
    h_hat_supervise = h_hat_supervise.astype(jnp.float32)
    h = h.astype(jnp.float32)
    loss_t0 = jnp.mean((x_tilde - x) ** 2)
    g_loss_s = jnp.mean((h_hat_supervise - h) ** 2) * 0.1
    loss = jnp.sqrt(loss_t0 + 1e-7) * 10.0 + g_loss_s + 1e-7
    return loss, loss_t0


def joint_eloss_mse(x_tilde, x, h_hat_supervise, h, use_pallas=None):
    """Pallas implementation of JointEloss(dis_func='MSE').forward."""
    assert x_tilde.shape == x.shape
    assert h_hat_supervise.shape == h.shape

    if use_pallas is None:
        # Tiny problems: fixed pallas_call / DMA launch overhead dwarfs the work;
        # XLA's fused reduction is faster there.
        use_pallas = (x.size + h.size) >= (1 << 15)
    if not use_pallas:
        return joint_eloss_mse_ref(x_tilde, x, h_hat_supervise, h)

    n_x = x.size
    n_h = h.size

    ssq_x = _sum_sq_diff(x_tilde, x)
    ssq_h = _sum_sq_diff(h_hat_supervise, h)

    # Finalize on scalars with compile-time reciprocals (no divides).
    loss_t0 = ssq_x * jnp.float32(1.0 / n_x)     # MSELoss(X_tilde, X)
    g_loss_s = ssq_h * jnp.float32(0.1 / n_h)    # 0.1 * MSELoss(H_hat_supervise, H)
    loss = jnp.sqrt(loss_t0 + 1e-7) * 10.0 + g_loss_s + 1e-7
    return loss, loss_t0


if __name__ == "__main__":
    key = jax.random.PRNGKey(0)
    k1, k2, k3, k4 = jax.random.split(key, 4)

    # Small shapes consistent with the module: (batch, seq, feat) / (batch, seq, hidden).
    B, T, D, HID = 2, 8, 32, 32
    x_tilde = jax.random.normal(k1, (B, T, D), dtype=jnp.float32)
    x = jax.random.normal(k2, (B, T, D), dtype=jnp.float32)
    h_hat = jax.random.normal(k3, (B, T, HID), dtype=jnp.float32)
    h = jax.random.normal(k4, (B, T, HID), dtype=jnp.float32)

    # Force the Pallas path so the kernel itself is exercised at the small shapes.
    loss, loss_t0 = joint_eloss_mse(x_tilde, x, h_hat, h, use_pallas=True)
    loss = jax.block_until_ready(loss)
    loss_t0 = jax.block_until_ready(loss_t0)
    loss_ref, loss_t0_ref = joint_eloss_mse_ref(x_tilde, x, h_hat, h)
    assert jnp.allclose(loss, loss_ref, rtol=1e-5, atol=1e-5), (loss, loss_ref)
    assert jnp.allclose(loss_t0, loss_t0_ref, rtol=1e-5, atol=1e-5), (loss_t0, loss_t0_ref)

    # Larger case: exercises the multi-tile grid + accumulator path (auto dispatch -> kernel).
    B2, T2, D2, HID2 = 4, 256, 96, 64
    k5, k6, k7, k8 = jax.random.split(jax.random.PRNGKey(1), 4)
    x_tilde2 = jax.random.normal(k5, (B2, T2, D2), dtype=jnp.float32)
    x2 = jax.random.normal(k6, (B2, T2, D2), dtype=jnp.float32)
    h_hat2 = jax.random.normal(k7, (B2, T2, HID2), dtype=jnp.float32)
    h2 = jax.random.normal(k8, (B2, T2, HID2), dtype=jnp.float32)

    loss2, loss_t02 = joint_eloss_mse(x_tilde2, x2, h_hat2, h2)
    loss2 = jax.block_until_ready(loss2)
    loss_t02 = jax.block_until_ready(loss_t02)
    loss2_ref, loss_t02_ref = joint_eloss_mse_ref(x_tilde2, x2, h_hat2, h2)
    assert jnp.allclose(loss2, loss2_ref, rtol=1e-4, atol=1e-5), (loss2, loss2_ref)
    assert jnp.allclose(loss_t02, loss_t02_ref, rtol=1e-4, atol=1e-5), (loss_t02, loss_t02_ref)

    print("KERNEL_OK")
</pallas_src>

<mosaic_0001>
module attributes {stable_mosaic.version = 11 : i64} {
  func.func @_sum_sq_diff_kernel(%arg0: i32, %arg1: memref<8x128xf32, #tpu.memory_space<vmem>>, %arg2: memref<8x128xf32, #tpu.memory_space<vmem>>, %arg3: memref<1x1xf32, #tpu.memory_space<smem>>, %arg4: memref<1x128xf32, #tpu.memory_space<vmem>>) attributes {dimension_semantics = [#tpu.dimension_semantics<arbitrary>], iteration_bounds = array<i64: 1>, scalar_prefetch = 0 : i64, scratch_operands = 1 : i64, tpu.core_type = #tpu.core_type<tc>, window_params = [{transform_indices = @transform_0, window_bounds = array<i64: 8, 128>}, {transform_indices = @transform_1, window_bounds = array<i64: 8, 128>}, {transform_indices = @transform_2, window_bounds = array<i64: 1, 1>}]} {
    %c0_i32 = arith.constant 0 : i32
    %0 = arith.cmpi eq, %arg0, %c0_i32 : i32
    %1 = arith.extui %0 : i1 to i32
    %c0_i32_0 = arith.constant 0 : i32
    %2 = arith.cmpi ne, %1, %c0_i32_0 : i32
    scf.if %2 {
      %cst_10 = arith.constant 0.000000e+00 : f32
      %15 = vector.broadcast %cst_10 : f32 to vector<1x128xf32>
      %c0_11 = arith.constant 0 : index
      %c0_12 = arith.constant 0 : index
      %16 = vector.load %arg4[%c0_11, %c0_12] : memref<1x128xf32, #tpu.memory_space<vmem>>, vector<1x128xf32>
      tpu.vector_store %arg4[%c0_11, %c0_12], %15 {strides = array<i32>} : memref<1x128xf32, #tpu.memory_space<vmem>>, vector<1x128xf32>,
    } else {
    }
    %c0 = arith.constant 0 : index
    %c0_1 = arith.constant 0 : index
    %3 = vector.load %arg1[%c0, %c0_1] : memref<8x128xf32, #tpu.memory_space<vmem>>, vector<8x128xf32>
    %c0_2 = arith.constant 0 : index
    %c0_3 = arith.constant 0 : index
    %4 = vector.load %arg2[%c0_2, %c0_3] : memref<8x128xf32, #tpu.memory_space<vmem>>, vector<8x128xf32>
    %5 = arith.subf %3, %4 : vector<8x128xf32>
    %c0_4 = arith.constant 0 : index
    %c0_5 = arith.constant 0 : index
    %6 = vector.load %arg4[%c0_4, %c0_5] : memref<1x128xf32, #tpu.memory_space<vmem>>, vector<1x128xf32>
    %7 = arith.mulf %5, %5 : vector<8x128xf32>
    %cst = arith.constant dense<0.000000e+00> : vector<128xf32>
    %8 = vector.multi_reduction <add>, %7, %cst [0] : vector<8x128xf32> to vector<128xf32>
    %9 = vector.shape_cast %8 : vector<128xf32> to vector<1x128xf32>
    %10 = arith.addf %6, %9 : vector<1x128xf32>
    %c0_6 = arith.constant 0 : index
    %c0_7 = arith.constant 0 : index
    %11 = vector.load %arg4[%c0_6, %c0_7] : memref<1x128xf32, #tpu.memory_space<vmem>>, vector<1x128xf32>
    tpu.vector_store %arg4[%c0_6, %c0_7], %10 {strides = array<i32>} : memref<1x128xf32, #tpu.memory_space<vmem>>, vector<1x128xf32>,
    %c0_i32_8 = arith.constant 0 : i32
    %12 = arith.cmpi eq, %arg0, %c0_i32_8 : i32
    %13 = arith.extui %12 : i1 to i32
    %c0_i32_9 = arith.constant 0 : i32
    %14 = arith.cmpi ne, %13, %c0_i32_9 : i32
    scf.if %14 {
      %c0_10 = arith.constant 0 : index
      %c0_11 = arith.constant 0 : index
      %15 = vector.load %arg4[%c0_10, %c0_11] : memref<1x128xf32, #tpu.memory_space<vmem>>, vector<1x128xf32>
      %16 = vector.shape_cast %15 : vector<1x128xf32> to vector<1x1x128xf32>
      %cst_12 = arith.constant dense<0.000000e+00> : vector<1xf32>
      %17 = vector.multi_reduction <add>, %16, %cst_12 [1, 2] : vector<1x1x128xf32> to vector<1xf32>
      %18 = vector.shape_cast %17 : vector<1xf32> to vector<1x1x1xf32>
      %19 = vector.extract %18[0, 0, 0] : f32 from vector<1x1x1xf32>
      %c0_13 = arith.constant 0 : index
      %c0_14 = arith.constant 0 : index
      %20 = memref.load %arg3[%c0_13, %c0_14] : memref<1x1xf32, #tpu.memory_space<smem>>
      memref.store %19, %arg3[%c0_13, %c0_14] : memref<1x1xf32, #tpu.memory_space<smem>>
    } else {
    }
    return
  }
  func.func @transform_0(%arg0: i32) -> (i32, i32) {
    %c0_i32 = arith.constant 0 : i32
    %c0_i32_0 = arith.constant 0 : i32
    return %arg0, %c0_i32 : i32, i32
  }
  func.func @transform_1(%arg0: i32) -> (i32, i32) {
    %c0_i32 = arith.constant 0 : i32
    %c0_i32_0 = arith.constant 0 : i32
    return %arg0, %c0_i32 : i32, i32
  }
  func.func @transform_2(%arg0: i32) -> (i32, i32) {
    %c0_i32 = arith.constant 0 : i32
    %c0_i32_0 = arith.constant 0 : i32
    %c0_i32_1 = arith.constant 0 : i32
    return %c0_i32, %c0_i32_0 : i32, i32
  }
}

</mosaic_0001>

<bundles_post_ra>
// kernel: tpu_custom_call.1
= control target key start
LH: loop header
LB: loop body
LE: loop exit
PB: predicated region body
PF: predicated region fallthrough
CT: control target
= control target key end

     0   :  { %7 = vsyncpa [#allocation4], 0  ;;  %s192_s0 = inlined_call_operand.hbm [shape: f32[8,128], index: 0, kind: input, shape index: {}]   ;;  %s193_s1 = inlined_call_operand.hbm [shape: f32[8,128], index: 1, kind: input, shape index: {}]   ;;  %s194_s2 = inlined_call_operand.hbm [shape: f32[1,1], index: 2, kind: output, shape index: {}]  }
   0x1   :  { %8 = vsyncpa [#allocation7], 0 }
   0x2   :  { %9 = vsyncpa [#allocation5], 0  ;;  %s15_s11 = sshll.u32 %s192_s0, 4  ;;  %s164_s12 = smov [#allocation3]   ;;  %s16_s11 = int_to_ptr.hbm [resolvable:$true] %s15_s11 }
   0x3   :  { %s17_s13 = sshll.u32 %s164_s12, 4  ;;  %s26_s16 = sshll.u32 %s193_s1, 4  ;;  %s18_s13 = int_to_ptr.vmem [resolvable:$true] %s17_s13  ;;  %s27_s16 = int_to_ptr.hbm [resolvable:$true] %s26_s16 }
   0x4   :  { %20 = dma.hbm_to_vmem [thread:$0]  %s16_s11, 128, %s18_s13, [#allocation4]  }
   0x5   :  { %s165_s17 = smov [#allocation6]  }
   0x6   :  { %s28_s18 = sshll.u32 %s165_s17, 4  ;;  %s29_s18 = int_to_ptr.vmem [resolvable:$true] %s28_s18 }
   0x7   :  { %31 = dma.hbm_to_vmem [thread:$0]  %s27_s16, 128, %s29_s18, [#allocation7]  }
   0x8   :  { %158 = dma.done.wait [#allocation4], 128  }
   0x9   :  { %159 = vsyncadd [#allocation4], 4294967168 }
   0xa   :  { %160 = dma.done.wait [#allocation7], 128  }
   0xb   :  { %161 = vsyncadd [#allocation7], 4294967168  ;;  %v166_v0 = vmov 0.0   ;;  %v45_v1 = vld [vmem:[#allocation3] sm:$0xff]  ;;  %v46_v2 = vld [vmem:[#allocation6] sm:$0xff]  ;;  %vm62_vm0 = vcmask 1040384  }
   0xc   :  { %44 = vst [vmem:[#allocation2] sm:$0x1] %v166_v0  ;;  %v47_v3 = vsub.f32 %v45_v1, %v46_v2  ;;  %s80_s19 = sshll.u32 %s194_s2, 4  ;;  %s167_s21 = smov [#allocation8]   ;;  %s81_s19 = int_to_ptr.hbm [resolvable:$true] %s80_s19 }
   0xe   :  { %v49_v4 = vmul.f32 %v47_v3, %v47_v3 }
  0x10   :  { %v50_v5 = vrot.slane %v49_v4, 4 }
  0x12   :  { %v51_v6 = vadd.f32 %v50_v5, %v49_v4 }
  0x13   :  { %v48_v10 = vld [vmem:[#allocation2] sm:$0x1] }
  0x14   :  { %v52_v7 = vrot.slane %v51_v6, 2 }
  0x16   :  { %v53_v8 = vadd.f32 %v52_v7, %v51_v6 }
  0x18   :  { %v54_v9 = vrot.slane %v53_v8, 1 }
  0x1a   :  { %v55_v11 = vadd.f32 %v54_v9, %v53_v8 }
  0x1c   :  { %v56_v12 = vadd.f32 %v55_v11, %v48_v10 }
  0x1e   :  { %57 = vst [vmem:[#allocation2] sm:$0x1] %v56_v12 }
  0x25   :  { %v61_v13 = vld [vmem:[#allocation2] sm:$0x1] }
  0x26   :  { %v63_v14 = vsel %vm62_vm0, %v61_v13, 0.0 }
  0x27   :  { %64 = vadd.xlane.f32.xlu0 %v63_v14 }
  0x9a   :  { %v65_v15 = vpop.xlane.xlu0 %64 }
  0x9b   :  { %v66_v16 = vrot.slane %v65_v15, 4 }
  0x9d   :  { %v67_v17 = vadd.f32 %v66_v16, %v65_v15 }
  0x9f   :  { %v68_v18 = vrot.slane %v67_v17, 2 }
  0xa1   :  { %v69_v19 = vadd.f32 %v68_v18, %v67_v17 }
  0xa3   :  { %v70_v20 = vrot.slane %v69_v19, 1 }
  0xa5   :  { %v71_v21 = vadd.f32 %v70_v20, %v69_v19 }
  0xa7   :  { %92 = vpush %v71_v21 }
  0xd8   :  { %s93_s20 = spop %92 }
  0xd9   :  { %74 = sst [smem:[#allocation8]] %s93_s20 }
  0xda   :  { %83 = dma.smem_to_hbm %s167_s21, 16, %s81_s19, [#allocation5]  }
  0xdb   :  { %162 = dma.done.wait [#allocation5], 16  }
  0xdc   :  { %163 = vsyncadd [#allocation5], 4294967280 }
  0xdd   :  { %88 = sfence }
  0xde   :  { %89 = vsyncpa [#allocation4], 1 }
  0xdf   :  { %90 = vsyncpa [#allocation7], 1 }
  0xe0   :  { %91 = vsyncpa [#allocation5], 1 }

</bundles_post_ra>
